<compile_context>
chip_gen: v5e
topology: v5e:2x2
jax: 0.10.0
libtpu: 0.0.40
codegen_flags: <defaults>
</compile_context>

<pallas_src>
import jax
import jax.numpy as jnp
from jax.experimental import pallas as pl
from jax.experimental.pallas import tpu as pltpu


# ---------------------------------------------------------------------------
# Kernels
# ---------------------------------------------------------------------------

def _ffn_kernel_resident(x_ref, w1_ref, b1_ref, w2_ref, b2_ref, o_ref):
    # x_ref : (TM, D)   w1_ref: (D, H)   b1_ref: (1, H) [f32]
    # w2_ref: (H, D)    b2_ref: (1, D) [f32]             o_ref: (TM, D)
    x = x_ref[...]                                               # native dtype -> MXU
    h = jnp.dot(x, w1_ref[...], preferred_element_type=jnp.float32)
    h = jnp.maximum(h + b1_ref[...], 0.0)                        # bias + ReLU (f32)
    h = h.astype(w2_ref.dtype)                                   # bf16-native MXU feed
    y = jnp.dot(h, w2_ref[...], preferred_element_type=jnp.float32) + b2_ref[...]
    o_ref[...] = y.astype(o_ref.dtype)


def _ffn_kernel_ktiled(x_ref, w1_ref, b1_ref, w2_ref, b2_ref, o_ref, acc_ref):
    # Hidden axis tiled as a trailing "arbitrary" grid dim (P3 accumulator).
    # ReLU is elementwise per hidden unit, so applying it per hidden chunk
    # before the second matmul is numerically exact.
    k = pl.program_id(1)

    @pl.when(k == 0)
    def _():
        acc_ref[...] = jnp.zeros_like(acc_ref)

    x = x_ref[...]
    h = jnp.dot(x, w1_ref[...], preferred_element_type=jnp.float32)
    h = jnp.maximum(h + b1_ref[...], 0.0)
    h = h.astype(w2_ref.dtype)
    acc_ref[...] += jnp.dot(h, w2_ref[...], preferred_element_type=jnp.float32)

    @pl.when(k == pl.num_programs(1) - 1)
    def _():
        o_ref[...] = (acc_ref[...] + b2_ref[...]).astype(o_ref.dtype)


# ---------------------------------------------------------------------------
# Wrapper
# ---------------------------------------------------------------------------

def _round_up(n, m):
    return ((n + m - 1) // m) * m


def _largest_divisor(n, unit, cap):
    """Largest d <= cap with d % unit == 0 and n % d == 0 (assumes n % unit == 0)."""
    best = unit
    d = unit
    cap = min(cap, n)
    while d <= cap:
        if n % d == 0:
            best = d
        d += unit
    return best


def _device_kind():
    try:
        return jax.devices()[0].device_kind.lower()
    except Exception:
        return ""


def _spec(block_shape, index_map, buffer_count=None):
    if buffer_count is None:
        return pl.BlockSpec(block_shape, index_map)
    return pl.BlockSpec(block_shape, index_map,
                        pipeline_mode=pl.Buffered(buffer_count))


def position_wise_ffn(x, w1, b1, w2, b2, *, block_m=None, mxu_bf16=False):
    """Y = relu(X @ W1 + b1) @ W2 + b2.

    x : (batch, seq, d_model)
    w1: (d_model, hidden)   b1: (hidden,)    (= PyTorch dense1.weight.T / .bias)
    w2: (hidden, d_model)   b2: (d_model,)   (= PyTorch dense2.weight.T / .bias)
    """
    batch, seq, d_model = x.shape
    hidden = w1.shape[1]
    M = batch * seq
    out_dtype = x.dtype

    # ---- generation-aware budgets ---------------------------------------
    kind = _device_kind()
    is_v7x = "v7" in kind
    vmem_cap = (56 if is_v7x else 100) * 1024 * 1024       # physical 64 / 128 MiB
    weight_budget = (24 if is_v7x else 64) * 1024 * 1024   # resident-weight budget
    if block_m is None:
        block_m = 256 if is_v7x else 512
    min_steps = 2 if is_v7x else 1                         # keep both v7x TCs busy

    # ---- optional bf16 MXU feed for f32 models (f32 accumulation kept) ---
    if mxu_bf16 and x.dtype == jnp.float32:
        x_mxu = x.astype(jnp.bfloat16)
        w1 = w1.astype(jnp.bfloat16)
        w2 = w2.astype(jnp.bfloat16)
    else:
        x_mxu = x
    w_dtype = w1.dtype
    wsize = jnp.dtype(w_dtype).itemsize
    xsize = jnp.dtype(x_mxu.dtype).itemsize
    osize = jnp.dtype(out_dtype).itemsize

    # ---- lane-dense feature dims (zero padding is exact) -----------------
    Dp = _round_up(d_model, 128)
    Hp = _round_up(hidden, 128)

    # ---- row tiling: avoid the pad/slice HBM round trip when possible ----
    def _choose_row_tiling():
        if M % 8 == 0:
            cap = min(block_m, M)
            if min_steps > 1:
                cap = min(cap, max(8, (M // min_steps) // 8 * 8))
            tm = _largest_divisor(M, 8, cap)
            if tm >= min(cap, 128) or M <= 1024:
                return tm, M                      # exact tiling, no M padding
        tm = min(block_m, _round_up(M, 8))
        mp = _round_up(M, tm)
        if min_steps > 1 and mp // tm < min_steps and M > 8:
            tm = _round_up((M + min_steps - 1) // min_steps, 8)
            mp = _round_up(M, tm)
        return tm, mp

    TM, Mp = _choose_row_tiling()

    # ---- resident-weight vs hidden-tiled (reduction) variant -------------
    resident_w_bytes = 2 * Dp * Hp * wsize        # single-buffered W1 + W2
    use_ktiled = resident_w_bytes > weight_budget
    if use_ktiled:
        cap_th = max(128, (weight_budget // (4 * Dp * wsize)) // 128 * 128)
        TH = _largest_divisor(Hp, 128, cap_th)
    else:
        TH = Hp

    # ---- operands (padded only when required) ----------------------------
    x2d = x_mxu.reshape(M, d_model)
    if Mp != M or Dp != d_model:
        x2d = jnp.pad(x2d, ((0, Mp - M), (0, Dp - d_model)))
    if Dp != d_model or Hp != hidden:
        w1p = jnp.pad(w1, ((0, Dp - d_model), (0, Hp - hidden)))
        w2p = jnp.pad(w2, ((0, Hp - hidden), (0, Dp - d_model)))
    else:
        w1p, w2p = w1, w2
    # Biases pre-cast to f32 here -> no per-step casts inside the kernel.
    b1_2d = jnp.pad(b1.astype(jnp.float32), ((0, Hp - hidden),)).reshape(1, Hp)
    b2_2d = jnp.pad(b2.astype(jnp.float32), ((0, Dp - d_model),)).reshape(1, Dp)

    cost = pl.CostEstimate(
        flops=int(4 * Mp * Dp * Hp),
        transcendentals=0,
        bytes_accessed=int(Mp * Dp * (xsize + osize) + 2 * Dp * Hp * wsize
                           + 4 * (Hp + Dp)),
    )

    def _run(weight_bufs):
        w_buf_count = 1 if weight_bufs == 1 else 2
        if not use_ktiled:
            grid = (Mp // TM,)
            in_specs = [
                pl.BlockSpec((TM, Dp), lambda i: (i, 0)),         # x: streams over M
                _spec((Dp, Hp), lambda i: (0, 0), weight_bufs),   # W1: VMEM-resident
                _spec((1, Hp),  lambda i: (0, 0), weight_bufs),   # b1
                _spec((Hp, Dp), lambda i: (0, 0), weight_bufs),   # W2
                _spec((1, Dp),  lambda i: (0, 0), weight_bufs),   # b2
            ]
            out_spec = pl.BlockSpec((TM, Dp), lambda i: (i, 0))
            kernel = _ffn_kernel_resident
            scratch = ()
            dim_sem = ("parallel",)
            need = (w_buf_count * (resident_w_bytes + 4 * (Hp + Dp))
                    + 2 * TM * Dp * (xsize + osize)               # x/out tiles (2 bufs)
                    + TM * Hp * (4 + wsize)                       # f32 interm + recast
                    + TM * Dp * 4)                                # f32 y tile
        else:
            # Hidden-axis reduction fallback (P3): chunked weights, f32 acc.
            grid = (Mp // TM, Hp // TH)
            in_specs = [
                pl.BlockSpec((TM, Dp), lambda i, k: (i, 0)),      # x (constant over k)
                pl.BlockSpec((Dp, TH), lambda i, k: (0, k)),      # W1 chunk (streams)
                pl.BlockSpec((1, TH),  lambda i, k: (0, k)),      # b1 chunk
                pl.BlockSpec((TH, Dp), lambda i, k: (k, 0)),      # W2 chunk (streams)
                _spec((1, Dp), lambda i, k: (0, 0), weight_bufs), # b2 resident
            ]
            out_spec = pl.BlockSpec((TM, Dp), lambda i, k: (i, 0))
            kernel = _ffn_kernel_ktiled
            scratch = (pltpu.VMEM((TM, Dp), jnp.float32),)
            dim_sem = ("parallel", "arbitrary")
            need = (2 * 2 * Dp * TH * wsize + 4 * (Hp + Dp)
                    + 2 * TM * Dp * (xsize + osize)
                    + TM * TH * (4 + wsize)
                    + 2 * TM * Dp * 4)

        vmem_limit = int(min(vmem_cap,
                             max(int(need * 1.25) + (2 << 20), 16 * 1024 * 1024)))

        return pl.pallas_call(
            kernel,
            out_shape=jax.ShapeDtypeStruct((Mp, Dp), out_dtype),
            grid=grid,
            in_specs=in_specs,
            out_specs=out_spec,
            scratch_shapes=scratch,
            compiler_params=pltpu.CompilerParams(
                dimension_semantics=dim_sem,
                vmem_limit_bytes=vmem_limit),
            cost_estimate=cost,
        )(x2d, w1p, b1_2d, w2p, b2_2d)

    try:
        out2d = _run(1)      # single-buffered resident weights (halves weight VMEM)
    except Exception:
        out2d = _run(None)   # fallback: default double-buffering (same numerics)

    if Mp != M or Dp != d_model:
        out2d = out2d[:M, :d_model]
    return out2d.reshape(batch, seq, d_model)


if __name__ == "__main__":
    # Shapes implied by the module: X (batch, seq, ffn_num_outputs)
    batch, seq = 2, 8
    ffn_num_outputs = 32     # d_model
    ffn_num_hiddens = 64     # hidden

    key = jax.random.PRNGKey(0)
    kx, k1, kb1, k2, kb2 = jax.random.split(key, 5)

    x = jax.random.normal(kx, (batch, seq, ffn_num_outputs), dtype=jnp.float32)

    # Deterministic param init (PyTorch Linear-style uniform bounds),
    # stored as (in, out) = PyTorch weight.T
    bound1 = 1.0 / (ffn_num_outputs ** 0.5)
    w1 = jax.random.uniform(k1, (ffn_num_outputs, ffn_num_hiddens),
                            minval=-bound1, maxval=bound1, dtype=jnp.float32)
    b1 = jax.random.uniform(kb1, (ffn_num_hiddens,),
                            minval=-bound1, maxval=bound1, dtype=jnp.float32)

    bound2 = 1.0 / (ffn_num_hiddens ** 0.5)
    w2 = jax.random.uniform(k2, (ffn_num_hiddens, ffn_num_outputs),
                            minval=-bound2, maxval=bound2, dtype=jnp.float32)
    b2 = jax.random.uniform(kb2, (ffn_num_outputs,),
                            minval=-bound2, maxval=bound2, dtype=jnp.float32)

    y = position_wise_ffn(x, w1, b1, w2, b2)
    y = jax.block_until_ready(y)

    # Pure-JAX reference check
    ref = jnp.maximum(x @ w1 + b1, 0.0) @ w2 + b2
    assert y.shape == (batch, seq, ffn_num_outputs)
    assert jnp.allclose(y, ref, atol=1e-5, rtol=1e-5)

    print("KERNEL_OK")
</pallas_src>

<mosaic_0001>
module attributes {stable_mosaic.version = 11 : i64} {
  func.func @_ffn_kernel_resident(%arg0: i32, %arg1: memref<16x128xf32, #tpu.memory_space<vmem>>, %arg2: memref<128x128xf32, #tpu.memory_space<vmem>>, %arg3: memref<1x128xf32, #tpu.memory_space<vmem>>, %arg4: memref<128x128xf32, #tpu.memory_space<vmem>>, %arg5: memref<1x128xf32, #tpu.memory_space<vmem>>, %arg6: memref<16x128xf32, #tpu.memory_space<vmem>>) attributes {dimension_semantics = [#tpu.dimension_semantics<parallel>], iteration_bounds = array<i64: 1>, scalar_prefetch = 0 : i64, scratch_operands = 0 : i64, tpu.core_type = #tpu.core_type<tc>, window_params = [{transform_indices = @transform_0, window_bounds = array<i64: 16, 128>}, {pipeline_mode = #tpu.pipeline_mode<synchronous>, transform_indices = @transform_1, window_bounds = array<i64: 128, 128>}, {pipeline_mode = #tpu.pipeline_mode<synchronous>, transform_indices = @transform_2, window_bounds = array<i64: 1, 128>}, {pipeline_mode = #tpu.pipeline_mode<synchronous>, transform_indices = @transform_3, window_bounds = array<i64: 128, 128>}, {pipeline_mode = #tpu.pipeline_mode<synchronous>, transform_indices = @transform_4, window_bounds = array<i64: 1, 128>}, {transform_indices = @transform_5, window_bounds = array<i64: 16, 128>}]} {
    %c0 = arith.constant 0 : index
    %c0_0 = arith.constant 0 : index
    %0 = vector.load %arg1[%c0, %c0_0] : memref<16x128xf32, #tpu.memory_space<vmem>>, vector<16x128xf32>
    %c0_1 = arith.constant 0 : index
    %c0_2 = arith.constant 0 : index
    %1 = vector.load %arg2[%c0_1, %c0_2] : memref<128x128xf32, #tpu.memory_space<vmem>>, vector<128x128xf32>
    %cst = arith.constant dense<0.000000e+00> : vector<16x128xf32>
    %2 = tpu.matmul %0, %1, %cst {dimension_numbers = #tpu.dot_dimension_numbers<[1], [0], [0], [1], [0, 0, 1, 1], [], []>} : vector<16x128xf32>, vector<128x128xf32>, vector<16x128xf32> -> vector<16x128xf32>
    %c0_3 = arith.constant 0 : index
    %c0_4 = arith.constant 0 : index
    %3 = vector.load %arg3[%c0_3, %c0_4] : memref<1x128xf32, #tpu.memory_space<vmem>>, vector<1x128xf32>
    %4 = vector.broadcast %3 : vector<1x128xf32> to vector<16x128xf32>
    %5 = arith.addf %2, %4 : vector<16x128xf32>
    %cst_5 = arith.constant 0.000000e+00 : f32
    %6 = vector.broadcast %cst_5 : f32 to vector<16x128xf32>
    %7 = arith.maximumf %5, %6 : vector<16x128xf32>
    %c0_6 = arith.constant 0 : index
    %c0_7 = arith.constant 0 : index
    %8 = vector.load %arg4[%c0_6, %c0_7] : memref<128x128xf32, #tpu.memory_space<vmem>>, vector<128x128xf32>
    %cst_8 = arith.constant dense<0.000000e+00> : vector<16x128xf32>
    %9 = tpu.matmul %7, %8, %cst_8 {dimension_numbers = #tpu.dot_dimension_numbers<[1], [0], [0], [1], [0, 0, 1, 1], [], []>} : vector<16x128xf32>, vector<128x128xf32>, vector<16x128xf32> -> vector<16x128xf32>
    %c0_9 = arith.constant 0 : index
    %c0_10 = arith.constant 0 : index
    %10 = vector.load %arg5[%c0_9, %c0_10] : memref<1x128xf32, #tpu.memory_space<vmem>>, vector<1x128xf32>
    %11 = vector.broadcast %10 : vector<1x128xf32> to vector<16x128xf32>
    %12 = arith.addf %9, %11 : vector<16x128xf32>
    %c0_11 = arith.constant 0 : index
    %c0_12 = arith.constant 0 : index
    %13 = vector.load %arg6[%c0_11, %c0_12] : memref<16x128xf32, #tpu.memory_space<vmem>>, vector<16x128xf32>
    tpu.vector_store %arg6[%c0_11, %c0_12], %12 {strides = array<i32>} : memref<16x128xf32, #tpu.memory_space<vmem>>, vector<16x128xf32>,
    return
  }
  func.func @transform_0(%arg0: i32) -> (i32, i32) {
    %c0_i32 = arith.constant 0 : i32
    %c0_i32_0 = arith.constant 0 : i32
    return %arg0, %c0_i32 : i32, i32
  }
  func.func @transform_1(%arg0: i32) -> (i32, i32) {
    %c0_i32 = arith.constant 0 : i32
    %c0_i32_0 = arith.constant 0 : i32
    %c0_i32_1 = arith.constant 0 : i32
    return %c0_i32, %c0_i32_0 : i32, i32
  }
  func.func @transform_2(%arg0: i32) -> (i32, i32) {
    %c0_i32 = arith.constant 0 : i32
    %c0_i32_0 = arith.constant 0 : i32
    %c0_i32_1 = arith.constant 0 : i32
    return %c0_i32, %c0_i32_0 : i32, i32
  }
  func.func @transform_3(%arg0: i32) -> (i32, i32) {
    %c0_i32 = arith.constant 0 : i32
    %c0_i32_0 = arith.constant 0 : i32
    %c0_i32_1 = arith.constant 0 : i32
    return %c0_i32, %c0_i32_0 : i32, i32
  }
  func.func @transform_4(%arg0: i32) -> (i32, i32) {
    %c0_i32 = arith.constant 0 : i32
    %c0_i32_0 = arith.constant 0 : i32
    %c0_i32_1 = arith.constant 0 : i32
    return %c0_i32, %c0_i32_0 : i32, i32
  }
  func.func @transform_5(%arg0: i32) -> (i32, i32) {
    %c0_i32 = arith.constant 0 : i32
    %c0_i32_0 = arith.constant 0 : i32
    return %arg0, %c0_i32 : i32, i32
  }
}

module attributes {stable_mosaic.version = 11 : i64} {
  func.func @_ffn_kernel_resident(%arg0: i32, %arg1: memref<16x128xf32, #tpu.memory_space<vmem>>, %arg2: memref<128x128xf32, #tpu.memory_space<vmem>>, %arg3: memref<1x128xf32, #tpu.memory_space<vmem>>, %arg4: memref<128x128xf32, #tpu.memory_space<vmem>>, %arg5: memref<1x128xf32, #tpu.memory_space<vmem>>, %arg6: memref<16x128xf32, #tpu.memory_space<vmem>>) attributes {dimension_semantics = [#tpu.dimension_semantics<parallel>], iteration_bounds = array<i64: 1>, scalar_prefetch = 0 : i64, scratch_operands = 0 : i64, tpu.core_type = #tpu.core_type<tc>, window_params = [{transform_indices = @transform_0, window_bounds = array<i64: 16, 128>}, {pipeline_mode = #tpu.pipeline_mode<synchronous>, transform_indices = @transform_1, window_bounds = array<i64: 128, 128>}, {pipeline_mode = #tpu.pipeline_mode<synchronous>, transform_indices = @transform_2, window_bounds = array<i64: 1, 128>}, {pipeline_mode = #tpu.pipeline_mode<synchronous>, transform_indices = @transform_3, window_bounds = array<i64: 128, 128>}, {pipeline_mode = #tpu.pipeline_mode<synchronous>, transform_indices = @transform_4, window_bounds = array<i64: 1, 128>}, {transform_indices = @transform_5, window_bounds = array<i64: 16, 128>}]} {
    %c0 = arith.constant 0 : index
    %c0_0 = arith.constant 0 : index
    %0 = vector.load %arg1[%c0, %c0_0] : memref<16x128xf32, #tpu.memory_space<vmem>>, vector<16x128xf32>
    %c0_1 = arith.constant 0 : index
    %c0_2 = arith.constant 0 : index
    %1 = vector.load %arg2[%c0_1, %c0_2] : memref<128x128xf32, #tpu.memory_space<vmem>>, vector<128x128xf32>
    %cst = arith.constant dense<0.000000e+00> : vector<16x128xf32>
    %2 = tpu.matmul %0, %1, %cst {dimension_numbers = #tpu.dot_dimension_numbers<[1], [0], [0], [1], [0, 0, 1, 1], [], []>} : vector<16x128xf32>, vector<128x128xf32>, vector<16x128xf32> -> vector<16x128xf32>
    %c0_3 = arith.constant 0 : index
    %c0_4 = arith.constant 0 : index
    %3 = vector.load %arg3[%c0_3, %c0_4] : memref<1x128xf32, #tpu.memory_space<vmem>>, vector<1x128xf32>
    %4 = vector.broadcast %3 : vector<1x128xf32> to vector<16x128xf32>
    %5 = arith.addf %2, %4 : vector<16x128xf32>
    %cst_5 = arith.constant 0.000000e+00 : f32
    %6 = vector.broadcast %cst_5 : f32 to vector<16x128xf32>
    %7 = arith.maximumf %5, %6 : vector<16x128xf32>
    %c0_6 = arith.constant 0 : index
    %c0_7 = arith.constant 0 : index
    %8 = vector.load %arg4[%c0_6, %c0_7] : memref<128x128xf32, #tpu.memory_space<vmem>>, vector<128x128xf32>
    %cst_8 = arith.constant dense<0.000000e+00> : vector<16x128xf32>
    %9 = tpu.matmul %7, %8, %cst_8 {dimension_numbers = #tpu.dot_dimension_numbers<[1], [0], [0], [1], [0, 0, 1, 1], [], []>} : vector<16x128xf32>, vector<128x128xf32>, vector<16x128xf32> -> vector<16x128xf32>
    %c0_9 = arith.constant 0 : index
    %c0_10 = arith.constant 0 : index
    %10 = vector.load %arg5[%c0_9, %c0_10] : memref<1x128xf32, #tpu.memory_space<vmem>>, vector<1x128xf32>
    %11 = vector.broadcast %10 : vector<1x128xf32> to vector<16x128xf32>
    %12 = arith.addf %9, %11 : vector<16x128xf32>
    %c0_11 = arith.constant 0 : index
    %c0_12 = arith.constant 0 : index
    %13 = vector.load %arg6[%c0_11, %c0_12] : memref<16x128xf32, #tpu.memory_space<vmem>>, vector<16x128xf32>
    tpu.vector_store %arg6[%c0_11, %c0_12], %12 {strides = array<i32>} : memref<16x128xf32, #tpu.memory_space<vmem>>, vector<16x128xf32>,
    return
  }
  func.func @transform_0(%arg0: i32) -> (i32, i32) {
    %c0_i32 = arith.constant 0 : i32
    %c0_i32_0 = arith.constant 0 : i32
    return %arg0, %c0_i32 : i32, i32
  }
  func.func @transform_1(%arg0: i32) -> (i32, i32) {
    %c0_i32 = arith.constant 0 : i32
    %c0_i32_0 = arith.constant 0 : i32
    %c0_i32_1 = arith.constant 0 : i32
    return %c0_i32, %c0_i32_0 : i32, i32
  }
  func.func @transform_2(%arg0: i32) -> (i32, i32) {
    %c0_i32 = arith.constant 0 : i32
    %c0_i32_0 = arith.constant 0 : i32
    %c0_i32_1 = arith.constant 0 : i32
    return %c0_i32, %c0_i32_0 : i32, i32
  }
  func.func @transform_3(%arg0: i32) -> (i32, i32) {
    %c0_i32 = arith.constant 0 : i32
    %c0_i32_0 = arith.constant 0 : i32
    %c0_i32_1 = arith.constant 0 : i32
    return %c0_i32, %c0_i32_0 : i32, i32
  }
  func.func @transform_4(%arg0: i32) -> (i32, i32) {
    %c0_i32 = arith.constant 0 : i32
    %c0_i32_0 = arith.constant 0 : i32
    %c0_i32_1 = arith.constant 0 : i32
    return %c0_i32, %c0_i32_0 : i32, i32
  }
  func.func @transform_5(%arg0: i32) -> (i32, i32) {
    %c0_i32 = arith.constant 0 : i32
    %c0_i32_0 = arith.constant 0 : i32
    return %arg0, %c0_i32 : i32, i32
  }
}

</mosaic_0001>

<bundles_post_ra>
// kernel: tpu_custom_call.1
= control target key start
LH: loop header
LB: loop body
LE: loop exit
PB: predicated region body
PF: predicated region fallthrough
CT: control target
= control target key end

     0   :  { %10 = vsyncpa [#allocation3], 0  ;;  %s388_s0 = inlined_call_operand.hbm [shape: f32[16,128], index: 0, kind: input, shape index: {}]   ;;  %s389_s1 = inlined_call_operand.hbm [shape: f32[128,128], index: 1, kind: input, shape index: {}]   ;;  %s390_s2 = inlined_call_operand.vmem [shape: f32[1,128], index: 2, kind: input, shape index: {}]   ;;  %s391_s3 = inlined_call_operand.hbm [shape: f32[128,128], index: 3, kind: input, shape index: {}]   ;;  %s392_s4 = inlined_call_operand.vmem [shape: f32[1,128], index: 4, kind: input, shape index: {}]   ;;  %s393_s5 = inlined_call_operand.hbm [shape: f32[16,128], index: 5, kind: output, shape index: {}]  }
   0x1   :  { %11 = vsyncpa [#allocation6], 0 }
   0x2   :  { %12 = vsyncpa [#allocation4], 0  ;;  %s30_s20 = sshll.u32 %s389_s1, 4  ;;  %s322_s21 = smov [#allocation5]   ;;  %s31_s20 = int_to_ptr.hbm [resolvable:$true] %s30_s20 }
   0x3   :  { %s32_s22 = sshll.u32 %s322_s21, 4  ;;  %s17_s25 = sshll.u32 %s388_s0, 4  ;;  %s33_s22 = int_to_ptr.vmem [resolvable:$true] %s32_s22  ;;  %s18_s25 = int_to_ptr.hbm [resolvable:$true] %s17_s25 }
   0x4   :  { %s323_s26 = smov 128   ;;  %s324_s27 = smov 8  }
   0x5   :  { %38 = dma.hbm_to_vmem [thread:$0]  %s31_s20, 2048, %s33_s22, [#allocation6], %s323_s26, %s323_s26, %s324_s27  }
   0x6   :  { %s325_s28 = smov [#allocation2]   ;;  %s45_s1 = sshll.u32 %s391_s3, 4  ;;  %s46_s1 = int_to_ptr.hbm [resolvable:$true] %s45_s1 }
   0x7   :  { %s19_s29 = sshll.u32 %s325_s28, 4  ;;  %s326_s0 = smov [#allocation7]   ;;  %s20_s29 = int_to_ptr.vmem [resolvable:$true] %s19_s29 }
   0x8   :  { %25 = dma.hbm_to_vmem [thread:$0]  %s18_s25, 256, %s20_s29, [#allocation3], %s323_s26, %s323_s26, %s324_s27  }
   0x9   :  { %s47_s7 = sshll.u32 %s326_s0, 4  ;;  %s48_s7 = int_to_ptr.vmem [resolvable:$true] %s47_s7 }
   0xa   :  { %53 = dma.hbm_to_vmem [thread:$0]  %s46_s1, 2048, %s48_s7, [#allocation6], %s323_s26, %s323_s26, %s324_s27  }
   0xb   :  { %316 = dma.done.wait [#allocation3], 256  }
   0xc   :  { %317 = vsyncadd [#allocation3], 4294967040 }
   0xd   :  { %318 = dma.done.wait [#allocation6], 4096  }
   0xe   :  { %319 = vsyncadd [#allocation6], 4294963200  ;;  %v85_v0 = vld [vmem:[#allocation5 + $0x78] sm:$0xff]  ;;  %v84_v1 = vld [vmem:[#allocation5 + $0x70] sm:$0xff]  ;;  %s327_s11 = smov [#allocation8]  }
   0xf   :  { %180 = vmatpush.msra.mxu2 %v85_v0  ;;  %90 = vmatpush.msra.mxu0 %v85_v0  ;;  %v83_v2 = vld [vmem:[#allocation5 + $0x68] sm:$0xff]  ;;  %v82_v3 = vld [vmem:[#allocation5 + $0x60] sm:$0xff]  ;;  %v81_v4 = vld [vmem:[#allocation5 + $0x58] sm:$0xff]  ;;  %s164_s12 = sshll.u32 %s327_s11, 4  ;;  %s165_s12 = int_to_ptr.vmem [resolvable:$true] %s164_s12 }
  0x10   :  { %v130_v5 = vld [vmem:[#allocation7 + $0x78] sm:$0xff]  ;;  %v129_v6 = vld [vmem:[#allocation7 + $0x70] sm:$0xff]  ;;  %v128_v8 = vld [vmem:[#allocation7 + $0x68] sm:$0xff] }
  0x11   :  { %181 = vmatpush.msra.mxu2 %v84_v1  ;;  %91 = vmatpush.msra.mxu0 %v84_v1  ;;  %v80_v7 = vld [vmem:[#allocation5 + $0x50] sm:$0xff]  ;;  %v79_v9 = vld [vmem:[#allocation5 + $0x48] sm:$0xff]  ;;  %v127_v10 = vld [vmem:[#allocation7 + $0x60] sm:$0xff] }
  0x12   :  { %196 = vmatpush.msra.mxu3 %v130_v5  ;;  %135 = vmatpush.msra.mxu1 %v130_v5  ;;  %v78_v11 = vld [vmem:[#allocation5 + $0x40] sm:$0xff]  ;;  %v126_v12 = vld [vmem:[#allocation7 + $0x58] sm:$0xff]  ;;  %v125_v14 = vld [vmem:[#allocation7 + $0x50] sm:$0xff] }
  0x13   :  { %182 = vmatpush.msra.mxu2 %v83_v2  ;;  %92 = vmatpush.msra.mxu0 %v83_v2  ;;  %v77_v13 = vld [vmem:[#allocation5 + $0x38] sm:$0xff]  ;;  %v76_v15 = vld [vmem:[#allocation5 + $0x30] sm:$0xff]  ;;  %v124_v16 = vld [vmem:[#allocation7 + $0x48] sm:$0xff] }
  0x14   :  { %197 = vmatpush.msra.mxu3 %v129_v6  ;;  %136 = vmatpush.msra.mxu1 %v129_v6  ;;  %v75_v17 = vld [vmem:[#allocation5 + $0x28] sm:$0xff]  ;;  %v123_v18 = vld [vmem:[#allocation7 + $0x40] sm:$0xff]  ;;  %v122_v20 = vld [vmem:[#allocation7 + $0x38] sm:$0xff] }
  0x15   :  { %183 = vmatpush.msra.mxu2 %v82_v3  ;;  %93 = vmatpush.msra.mxu0 %v82_v3  ;;  %v74_v19 = vld [vmem:[#allocation5 + $0x20] sm:$0xff]  ;;  %v73_v21 = vld [vmem:[#allocation5 + $0x18] sm:$0xff]  ;;  %v121_v22 = vld [vmem:[#allocation7 + $0x30] sm:$0xff] }
  0x16   :  { %198 = vmatpush.msra.mxu3 %v128_v8  ;;  %137 = vmatpush.msra.mxu1 %v128_v8  ;;  %v72_v23 = vld [vmem:[#allocation5 + $0x10] sm:$0xff]  ;;  %v120_v24 = vld [vmem:[#allocation7 + $0x28] sm:$0xff]  ;;  %v119_v26 = vld [vmem:[#allocation7 + $0x20] sm:$0xff] }
  0x17   :  { %184 = vmatpush.msra.mxu2 %v81_v4  ;;  %94 = vmatpush.msra.mxu0 %v81_v4  ;;  %v71_v25 = vld [vmem:[#allocation5 + $0x8] sm:$0xff]  ;;  %v70_v27 = vld [vmem:[#allocation5] sm:$0xff]  ;;  %v69_v28 = vld [vmem:[#allocation2 + $0x8] sm:$0xff] }
  0x18   :  { %199 = vmatpush.msra.mxu3 %v127_v10  ;;  %138 = vmatpush.msra.mxu1 %v127_v10  ;;  %v68_v29 = vld [vmem:[#allocation2] sm:$0xff]  ;;  %v118_v30 = vld [vmem:[#allocation7 + $0x18] sm:$0xff]  ;;  %v116_v32 = vld [vmem:[#allocation7 + $0x8] sm:$0xff] }
  0x19   :  { %185 = vmatpush.msra.mxu2 %v80_v7  ;;  %95 = vmatpush.msra.mxu0 %v80_v7  ;;  %v117_v31 = vld [vmem:[#allocation7 + $0x10] sm:$0xff]  ;;  %v115_v33 = vld [vmem:[#allocation7] sm:$0xff] }
  0x1a   :  { %200 = vmatpush.msra.mxu3 %v126_v12  ;;  %139 = vmatpush.msra.mxu1 %v126_v12  ;;  %v218_v34 = vld [vmem:[%s390_s2] ss:$0 sm:$0xff]  ;;  %s166_s2 = sshll.u32 %s393_s5, 4  ;;  %s167_s2 = int_to_ptr.hbm [resolvable:$true] %s166_s2 }
  0x1b   :  { %186 = vmatpush.msra.mxu2 %v79_v9  ;;  %96 = vmatpush.msra.mxu0 %v79_v9  ;;  %v219_v41 = vld [vmem:[%s392_s4] ss:$0 sm:$0xff] }
  0x1c   :  { %201 = vmatpush.msra.mxu3 %v125_v14  ;;  %140 = vmatpush.msra.mxu1 %v125_v14 }
  0x1d   :  { %187 = vmatpush.msra.mxu2 %v78_v11  ;;  %97 = vmatpush.msra.mxu0 %v78_v11 }
  0x1e   :  { %202 = vmatpush.msra.mxu3 %v124_v16  ;;  %141 = vmatpush.msra.mxu1 %v124_v16 }
  0x1f   :  { %188 = vmatpush.msra.mxu2 %v77_v13  ;;  %98 = vmatpush.msra.mxu0 %v77_v13 }
  0x20   :  { %203 = vmatpush.msra.mxu3 %v123_v18  ;;  %142 = vmatpush.msra.mxu1 %v123_v18 }
  0x21   :  { %189 = vmatpush.msra.mxu2 %v76_v15  ;;  %99 = vmatpush.msra.mxu0 %v76_v15 }
  0x22   :  { %204 = vmatpush.msra.mxu3 %v122_v20  ;;  %143 = vmatpush.msra.mxu1 %v122_v20 }
  0x23   :  { %190 = vmatpush.msra.mxu2 %v75_v17  ;;  %100 = vmatpush.msra.mxu0 %v75_v17 }
  0x24   :  { %205 = vmatpush.msra.mxu3 %v121_v22  ;;  %144 = vmatpush.msra.mxu1 %v121_v22 }
  0x25   :  { %191 = vmatpush.msra.mxu2 %v74_v19  ;;  %101 = vmatpush.msra.mxu0 %v74_v19 }
  0x26   :  { %206 = vmatpush.msra.mxu3 %v120_v24  ;;  %145 = vmatpush.msra.mxu1 %v120_v24 }
  0x27   :  { %192 = vmatpush.msra.mxu2 %v73_v21  ;;  %102 = vmatpush.msra.mxu0 %v73_v21 }
  0x28   :  { %207 = vmatpush.msra.mxu3 %v119_v26  ;;  %146 = vmatpush.msra.mxu1 %v119_v26 }
  0x29   :  { %193 = vmatpush.msra.mxu2 %v72_v23  ;;  %103 = vmatpush.msra.mxu0 %v72_v23 }
  0x2a   :  { %208 = vmatpush.msra.mxu3 %v118_v30  ;;  %147 = vmatpush.msra.mxu1 %v118_v30 }
  0x2b   :  { %194 = vmatpush.msra.mxu2 %v71_v25  ;;  %104 = vmatpush.msra.mxu0 %v71_v25 }
  0x2c   :  { %209 = vmatpush.msra.mxu3 %v117_v31  ;;  %148 = vmatpush.msra.mxu1 %v117_v31 }
  0x2d   :  { %195 = vmatpush.msra.mxu2 %v70_v27  ;;  %105 = vmatpush.msra.mxu0 %v70_v27 }
  0x2e   :  { %109 = vmatmul.f32.vlgmr.msra.gmra.mxu2 %v69_v28  ;;  %106 = vmatmul.f32.vlgmr.msra.gmra.mxu0 %v68_v29 }
  0x2f   :  { %210 = vmatpush.msra.mxu3 %v116_v32  ;;  %149 = vmatpush.msra.mxu1 %v116_v32 }
  0x31   :  { %211 = vmatpush.msra.mxu3 %v115_v33  ;;  %150 = vmatpush.msra.mxu1 %v115_v33 }
  0xab   :  { %v107_v35 = vpop.f32.mrf.mxu0 }
  0xac   :  { %v108_v36 = vadd.f32 %v218_v34, %v107_v35 }
  0xae   :  { %v113_v37 = vmax.f32 %v108_v36, 0.0 }
  0xb0   :  { %151 = vmatmul.f32.vlgmr.msra.gmra.mxu1 %v113_v37 }
  0xb1   :  { %v110_v38 = vpop.f32.mrf.mxu2 }
  0xb2   :  { %v111_v39 = vadd.f32 %v218_v34, %v110_v38 }
  0xb4   :  { %v114_v40 = vmax.f32 %v111_v39, 0.0 }
  0xb6   :  { %154 = vmatmul.f32.vlgmr.msra.gmra.mxu3 %v114_v40 }
 0x12d   :  { %v152_v42 = vpop.f32.mrf.mxu1 }
 0x12e   :  { %v153_v43 = vadd.f32 %v219_v41, %v152_v42 }
 0x130   :  { %158 = vst [vmem:[#allocation8] sm:$0xff] %v153_v43 }
 0x139   :  { %v155_v44 = vpop.f32.mrf.mxu3 }
 0x13a   :  { %v156_v45 = vadd.f32 %v219_v41, %v155_v44 }
 0x13c   :  { %159 = vst [vmem:[#allocation8 + $0x8] sm:$0xff] %v156_v45 }
 0x13d   :  { %172 = dma.vmem_to_hbm [thread:$0]  %s165_s12, 256, %s167_s2, [#allocation4], %s323_s26, %s323_s26, %s324_s27  }
 0x13e   :  { %320 = dma.done.wait [#allocation4], 256  }
 0x13f   :  { %321 = vsyncadd [#allocation4], 4294967040 }
 0x140   :  { %177 = vsyncpa [#allocation3], 1 }
 0x141   :  { %178 = vsyncpa [#allocation6], 1 }
 0x142   :  { %179 = vsyncpa [#allocation4], 1 }

// kernel: tpu_custom_call.1
= control target key start
LH: loop header
LB: loop body
LE: loop exit
PB: predicated region body
PF: predicated region fallthrough
CT: control target
= control target key end

     0   :  { %10 = vsyncpa [#allocation3], 0  ;;  %s388_s0 = inlined_call_operand.hbm [shape: f32[16,128], index: 0, kind: input, shape index: {}]   ;;  %s389_s1 = inlined_call_operand.hbm [shape: f32[128,128], index: 1, kind: input, shape index: {}]   ;;  %s390_s2 = inlined_call_operand.vmem [shape: f32[1,128], index: 2, kind: input, shape index: {}]   ;;  %s391_s3 = inlined_call_operand.hbm [shape: f32[128,128], index: 3, kind: input, shape index: {}]   ;;  %s392_s4 = inlined_call_operand.vmem [shape: f32[1,128], index: 4, kind: input, shape index: {}]   ;;  %s393_s5 = inlined_call_operand.hbm [shape: f32[16,128], index: 5, kind: output, shape index: {}]  }
   0x1   :  { %11 = vsyncpa [#allocation6], 0 }
   0x2   :  { %12 = vsyncpa [#allocation4], 0  ;;  %s30_s20 = sshll.u32 %s389_s1, 4  ;;  %s322_s21 = smov [#allocation5]   ;;  %s31_s20 = int_to_ptr.hbm [resolvable:$true] %s30_s20 }
   0x3   :  { %s32_s22 = sshll.u32 %s322_s21, 4  ;;  %s17_s25 = sshll.u32 %s388_s0, 4  ;;  %s33_s22 = int_to_ptr.vmem [resolvable:$true] %s32_s22  ;;  %s18_s25 = int_to_ptr.hbm [resolvable:$true] %s17_s25 }
   0x4   :  { %s323_s26 = smov 128   ;;  %s324_s27 = smov 8  }
   0x5   :  { %38 = dma.hbm_to_vmem [thread:$0]  %s31_s20, 2048, %s33_s22, [#allocation6], %s323_s26, %s323_s26, %s324_s27  }
   0x6   :  { %s325_s28 = smov [#allocation2]   ;;  %s45_s1 = sshll.u32 %s391_s3, 4  ;;  %s46_s1 = int_to_ptr.hbm [resolvable:$true] %s45_s1 }
   0x7   :  { %s19_s29 = sshll.u32 %s325_s28, 4  ;;  %s326_s0 = smov [#allocation7]   ;;  %s20_s29 = int_to_ptr.vmem [resolvable:$true] %s19_s29 }
   0x8   :  { %25 = dma.hbm_to_vmem [thread:$0]  %s18_s25, 256, %s20_s29, [#allocation3], %s323_s26, %s323_s26, %s324_s27  }
   0x9   :  { %s47_s7 = sshll.u32 %s326_s0, 4  ;;  %s48_s7 = int_to_ptr.vmem [resolvable:$true] %s47_s7 }
   0xa   :  { %53 = dma.hbm_to_vmem [thread:$0]  %s46_s1, 2048, %s48_s7, [#allocation6], %s323_s26, %s323_s26, %s324_s27  }
   0xb   :  { %316 = dma.done.wait [#allocation3], 256  }
   0xc   :  { %317 = vsyncadd [#allocation3], 4294967040 }
   0xd   :  { %318 = dma.done.wait [#allocation6], 4096  }
   0xe   :  { %319 = vsyncadd [#allocation6], 4294963200  ;;  %v85_v0 = vld [vmem:[#allocation5 + $0x78] sm:$0xff]  ;;  %v84_v1 = vld [vmem:[#allocation5 + $0x70] sm:$0xff]  ;;  %s327_s11 = smov [#allocation8]  }
   0xf   :  { %180 = vmatpush.msra.mxu2 %v85_v0  ;;  %90 = vmatpush.msra.mxu0 %v85_v0  ;;  %v83_v2 = vld [vmem:[#allocation5 + $0x68] sm:$0xff]  ;;  %v82_v3 = vld [vmem:[#allocation5 + $0x60] sm:$0xff]  ;;  %v81_v4 = vld [vmem:[#allocation5 + $0x58] sm:$0xff]  ;;  %s164_s12 = sshll.u32 %s327_s11, 4  ;;  %s165_s12 = int_to_ptr.vmem [resolvable:$true] %s164_s12 }
  0x10   :  { %v130_v5 = vld [vmem:[#allocation7 + $0x78] sm:$0xff]  ;;  %v129_v6 = vld [vmem:[#allocation7 + $0x70] sm:$0xff]  ;;  %v128_v8 = vld [vmem:[#allocation7 + $0x68] sm:$0xff] }
  0x11   :  { %181 = vmatpush.msra.mxu2 %v84_v1  ;;  %91 = vmatpush.msra.mxu0 %v84_v1  ;;  %v80_v7 = vld [vmem:[#allocation5 + $0x50] sm:$0xff]  ;;  %v79_v9 = vld [vmem:[#allocation5 + $0x48] sm:$0xff]  ;;  %v127_v10 = vld [vmem:[#allocation7 + $0x60] sm:$0xff] }
  0x12   :  { %196 = vmatpush.msra.mxu3 %v130_v5  ;;  %135 = vmatpush.msra.mxu1 %v130_v5  ;;  %v78_v11 = vld [vmem:[#allocation5 + $0x40] sm:$0xff]  ;;  %v126_v12 = vld [vmem:[#allocation7 + $0x58] sm:$0xff]  ;;  %v125_v14 = vld [vmem:[#allocation7 + $0x50] sm:$0xff] }
  0x13   :  { %182 = vmatpush.msra.mxu2 %v83_v2  ;;  %92 = vmatpush.msra.mxu0 %v83_v2  ;;  %v77_v13 = vld [vmem:[#allocation5 + $0x38] sm:$0xff]  ;;  %v76_v15 = vld [vmem:[#allocation5 + $0x30] sm:$0xff]  ;;  %v124_v16 = vld [vmem:[#allocation7 + $0x48] sm:$0xff] }
  0x14   :  { %197 = vmatpush.msra.mxu3 %v129_v6  ;;  %136 = vmatpush.msra.mxu1 %v129_v6  ;;  %v75_v17 = vld [vmem:[#allocation5 + $0x28] sm:$0xff]  ;;  %v123_v18 = vld [vmem:[#allocation7 + $0x40] sm:$0xff]  ;;  %v122_v20 = vld [vmem:[#allocation7 + $0x38] sm:$0xff] }
  0x15   :  { %183 = vmatpush.msra.mxu2 %v82_v3  ;;  %93 = vmatpush.msra.mxu0 %v82_v3  ;;  %v74_v19 = vld [vmem:[#allocation5 + $0x20] sm:$0xff]  ;;  %v73_v21 = vld [vmem:[#allocation5 + $0x18] sm:$0xff]  ;;  %v121_v22 = vld [vmem:[#allocation7 + $0x30] sm:$0xff] }
  0x16   :  { %198 = vmatpush.msra.mxu3 %v128_v8  ;;  %137 = vmatpush.msra.mxu1 %v128_v8  ;;  %v72_v23 = vld [vmem:[#allocation5 + $0x10] sm:$0xff]  ;;  %v120_v24 = vld [vmem:[#allocation7 + $0x28] sm:$0xff]  ;;  %v119_v26 = vld [vmem:[#allocation7 + $0x20] sm:$0xff] }
  0x17   :  { %184 = vmatpush.msra.mxu2 %v81_v4  ;;  %94 = vmatpush.msra.mxu0 %v81_v4  ;;  %v71_v25 = vld [vmem:[#allocation5 + $0x8] sm:$0xff]  ;;  %v70_v27 = vld [vmem:[#allocation5] sm:$0xff]  ;;  %v69_v28 = vld [vmem:[#allocation2 + $0x8] sm:$0xff] }
  0x18   :  { %199 = vmatpush.msra.mxu3 %v127_v10  ;;  %138 = vmatpush.msra.mxu1 %v127_v10  ;;  %v68_v29 = vld [vmem:[#allocation2] sm:$0xff]  ;;  %v118_v30 = vld [vmem:[#allocation7 + $0x18] sm:$0xff]  ;;  %v116_v32 = vld [vmem:[#allocation7 + $0x8] sm:$0xff] }
  0x19   :  { %185 = vmatpush.msra.mxu2 %v80_v7  ;;  %95 = vmatpush.msra.mxu0 %v80_v7  ;;  %v117_v31 = vld [vmem:[#allocation7 + $0x10] sm:$0xff]  ;;  %v115_v33 = vld [vmem:[#allocation7] sm:$0xff] }
  0x1a   :  { %200 = vmatpush.msra.mxu3 %v126_v12  ;;  %139 = vmatpush.msra.mxu1 %v126_v12  ;;  %v218_v34 = vld [vmem:[%s390_s2] ss:$0 sm:$0xff]  ;;  %s166_s2 = sshll.u32 %s393_s5, 4  ;;  %s167_s2 = int_to_ptr.hbm [resolvable:$true] %s166_s2 }
  0x1b   :  { %186 = vmatpush.msra.mxu2 %v79_v9  ;;  %96 = vmatpush.msra.mxu0 %v79_v9  ;;  %v219_v41 = vld [vmem:[%s392_s4] ss:$0 sm:$0xff] }
  0x1c   :  { %201 = vmatpush.msra.mxu3 %v125_v14  ;;  %140 = vmatpush.msra.mxu1 %v125_v14 }
  0x1d   :  { %187 = vmatpush.msra.mxu2 %v78_v11  ;;  %97 = vmatpush.msra.mxu0 %v78_v11 }
  0x1e   :  { %202 = vmatpush.msra.mxu3 %v124_v16  ;;  %141 = vmatpush.msra.mxu1 %v124_v16 }
  0x1f   :  { %188 = vmatpush.msra.mxu2 %v77_v13  ;;  %98 = vmatpush.msra.mxu0 %v77_v13 }
  0x20   :  { %203 = vmatpush.msra.mxu3 %v123_v18  ;;  %142 = vmatpush.msra.mxu1 %v123_v18 }
  0x21   :  { %189 = vmatpush.msra.mxu2 %v76_v15  ;;  %99 = vmatpush.msra.mxu0 %v76_v15 }
  0x22   :  { %204 = vmatpush.msra.mxu3 %v122_v20  ;;  %143 = vmatpush.msra.mxu1 %v122_v20 }
  0x23   :  { %190 = vmatpush.msra.mxu2 %v75_v17  ;;  %100 = vmatpush.msra.mxu0 %v75_v17 }
  0x24   :  { %205 = vmatpush.msra.mxu3 %v121_v22  ;;  %144 = vmatpush.msra.mxu1 %v121_v22 }
  0x25   :  { %191 = vmatpush.msra.mxu2 %v74_v19  ;;  %101 = vmatpush.msra.mxu0 %v74_v19 }
  0x26   :  { %206 = vmatpush.msra.mxu3 %v120_v24  ;;  %145 = vmatpush.msra.mxu1 %v120_v24 }
  0x27   :  { %192 = vmatpush.msra.mxu2 %v73_v21  ;;  %102 = vmatpush.msra.mxu0 %v73_v21 }
  0x28   :  { %207 = vmatpush.msra.mxu3 %v119_v26  ;;  %146 = vmatpush.msra.mxu1 %v119_v26 }
  0x29   :  { %193 = vmatpush.msra.mxu2 %v72_v23  ;;  %103 = vmatpush.msra.mxu0 %v72_v23 }
  0x2a   :  { %208 = vmatpush.msra.mxu3 %v118_v30  ;;  %147 = vmatpush.msra.mxu1 %v118_v30 }
  0x2b   :  { %194 = vmatpush.msra.mxu2 %v71_v25  ;;  %104 = vmatpush.msra.mxu0 %v71_v25 }
  0x2c   :  { %209 = vmatpush.msra.mxu3 %v117_v31  ;;  %148 = vmatpush.msra.mxu1 %v117_v31 }
  0x2d   :  { %195 = vmatpush.msra.mxu2 %v70_v27  ;;  %105 = vmatpush.msra.mxu0 %v70_v27 }
  0x2e   :  { %109 = vmatmul.f32.vlgmr.msra.gmra.mxu2 %v69_v28  ;;  %106 = vmatmul.f32.vlgmr.msra.gmra.mxu0 %v68_v29 }
  0x2f   :  { %210 = vmatpush.msra.mxu3 %v116_v32  ;;  %149 = vmatpush.msra.mxu1 %v116_v32 }
  0x31   :  { %211 = vmatpush.msra.mxu3 %v115_v33  ;;  %150 = vmatpush.msra.mxu1 %v115_v33 }
  0xab   :  { %v107_v35 = vpop.f32.mrf.mxu0 }
  0xac   :  { %v108_v36 = vadd.f32 %v218_v34, %v107_v35 }
  0xae   :  { %v113_v37 = vmax.f32 %v108_v36, 0.0 }
  0xb0   :  { %151 = vmatmul.f32.vlgmr.msra.gmra.mxu1 %v113_v37 }
  0xb1   :  { %v110_v38 = vpop.f32.mrf.mxu2 }
  0xb2   :  { %v111_v39 = vadd.f32 %v218_v34, %v110_v38 }
  0xb4   :  { %v114_v40 = vmax.f32 %v111_v39, 0.0 }
  0xb6   :  { %154 = vmatmul.f32.vlgmr.msra.gmra.mxu3 %v114_v40 }
 0x12d   :  { %v152_v42 = vpop.f32.mrf.mxu1 }
 0x12e   :  { %v153_v43 = vadd.f32 %v219_v41, %v152_v42 }
 0x130   :  { %158 = vst [vmem:[#allocation8] sm:$0xff] %v153_v43 }
 0x139   :  { %v155_v44 = vpop.f32.mrf.mxu3 }
 0x13a   :  { %v156_v45 = vadd.f32 %v219_v41, %v155_v44 }
 0x13c   :  { %159 = vst [vmem:[#allocation8 + $0x8] sm:$0xff] %v156_v45 }
 0x13d   :  { %172 = dma.vmem_to_hbm [thread:$0]  %s165_s12, 256, %s167_s2, [#allocation4], %s323_s26, %s323_s26, %s324_s27  }
 0x13e   :  { %320 = dma.done.wait [#allocation4], 256  }
 0x13f   :  { %321 = vsyncadd [#allocation4], 4294967040 }
 0x140   :  { %177 = vsyncpa [#allocation3], 1 }
 0x141   :  { %178 = vsyncpa [#allocation6], 1 }
 0x142   :  { %179 = vsyncpa [#allocation4], 1 }

</bundles_post_ra>
